<compile_context>
chip_gen: v7x
topology: tpu7x:2x2x1
jax: 0.10.0
libtpu: 0.0.40
codegen_flags: <defaults>
</compile_context>

<pallas_src>
import numpy as np
import jax
import jax.numpy as jnp
from jax.experimental import pallas as pl
from jax.experimental.pallas import tpu as pltpu


# ----------------------------- Pallas kernel --------------------------------
def _cca_kernel(x_ref, g_ref, wx_ref, wg_ref, b_ref, o_ref):
    """Fused CCA forward for one block of Bn batch elements.

    x_ref : (Bn, F_x, HWx)  features (channels on sublanes, spatial on lanes)
    g_ref : (Bn, F_g, HWg)  gating signal
    wx_ref: (F_x, F_x)      (0.5 / HWx) * W_x^T   (pre-folded in wrapper)
    wg_ref: (F_g, F_x)      (0.5 / HWg) * W_g^T
    b_ref : (1, F_x)        0.5 * (b_x + b_g)
    o_ref : (Bn, F_x, HWx)
    """
    x = x_ref[...]
    g = g_ref[...]

    # Pool first (cheap XLU lane reduce over the spatial axis), then two tiny
    # GEMMs -- no O(F^2 * HW) MXU work in this otherwise memory-bound kernel.
    sum_x = jnp.sum(x, axis=-1)                    # (Bn, F_x)
    sum_g = jnp.sum(g, axis=-1)                    # (Bn, F_g)

    z = (jnp.dot(sum_x, wx_ref[...], preferred_element_type=jnp.float32)
         + jnp.dot(sum_g, wg_ref[...], preferred_element_type=jnp.float32)
         + b_ref[...])                             # (Bn, F_x)
    scale = jax.nn.sigmoid(z)                      # EUP

    # Lean epilogue: broadcast-mul + relu + lane-dense store.
    o_ref[...] = jnp.maximum(x * scale[:, :, None], 0.0).astype(o_ref.dtype)


# ------------------------------ wrapper --------------------------------------
def _choose_block_n(n, per_elem_bytes, budget_bytes):
    """Largest divisor of n whose x+g+out tile set fits the VMEM budget."""
    divisors = [d for d in range(1, n + 1) if n % d == 0]
    fitting = [d for d in divisors if d * per_elem_bytes <= budget_bytes] or [1]
    bn = max(fitting)
    # Prefer >= 2 grid steps when N >= 2 so both v7x TensorCores get work.
    if n >= 2 and n // bn < 2:
        halves = [d for d in fitting if n // d >= 2]
        if halves:
            bn = max(halves)
    return bn


def cca_forward(g, x, w_x, b_x, w_g, b_g):
    """CCA forward.

    g:   (N, F_g, Hg, Wg)   gating signal (NCHW)
    x:   (N, F_x, H,  W)    features to be re-weighted (NCHW)
    w_x: (F_x, F_x), b_x: (F_x,)   -- torch Linear(F_x, F_x) params
    w_g: (F_x, F_g), b_g: (F_x,)   -- torch Linear(F_g, F_x) params
    returns (N, F_x, H, W)
    """
    N, F_x, H, W = x.shape
    Ng, F_g, Hg, Wg = g.shape
    assert N == Ng
    HWx = H * W
    HWg = Hg * Wg

    # Free reshapes only -- NCHW kept, no transposes / extra HBM passes.
    x3 = x.reshape(N, F_x, HWx)
    g3 = g.reshape(N, F_g, HWg)

    # Fold pooling normalisation, the /2 and both biases into the (transposed)
    # weights / one bias row: O(F^2) wrapper work, one fewer kernel input.
    wx_eff = (w_x.T * (0.5 / HWx)).astype(jnp.float32)          # (F_x, F_x)
    wg_eff = (w_g.T * (0.5 / HWg)).astype(jnp.float32)          # (F_g, F_x)
    b_eff = (0.5 * (b_x + b_g)).reshape(1, F_x).astype(jnp.float32)

    # Per-step footprint (x tile + g tile + out tile).  Keep each tile set
    # under ~6 MiB so double-buffering stays inside v5e's 16 MiB / v7x's
    # 32 MiB scoped VMEM with headroom.
    bytes_per_elem = (2 * F_x * HWx + F_g * HWg) * x.dtype.itemsize
    budget = 6 * 1024 * 1024
    bn = _choose_block_n(N, bytes_per_elem, budget)
    grid = (N // bn,)

    per_step = bn * bytes_per_elem
    vmem_limit = int(min(100 * 1024 * 1024,
                         max(16 * 1024 * 1024, 4 * per_step)))

    out3 = pl.pallas_call(
        _cca_kernel,
        out_shape=jax.ShapeDtypeStruct((N, F_x, HWx), x.dtype),
        grid=grid,
        in_specs=[
            pl.BlockSpec((bn, F_x, HWx), lambda n: (n, 0, 0)),
            pl.BlockSpec((bn, F_g, HWg), lambda n: (n, 0, 0)),
            pl.BlockSpec((F_x, F_x), lambda n: (0, 0)),
            pl.BlockSpec((F_g, F_x), lambda n: (0, 0)),
            pl.BlockSpec((1, F_x), lambda n: (0, 0)),
        ],
        out_specs=pl.BlockSpec((bn, F_x, HWx), lambda n: (n, 0, 0)),
        compiler_params=pltpu.CompilerParams(
            dimension_semantics=("parallel",),
            vmem_limit_bytes=vmem_limit),
    )(x3, g3, wx_eff, wg_eff, b_eff)

    return out3.reshape(N, F_x, H, W)


# ------------------------------- main ----------------------------------------
if __name__ == "__main__":
    # small, module-consistent shapes
    N, F_x, F_g = 2, 4, 8
    H, W = 16, 16           # x spatial
    Hg, Wg = 16, 16         # g spatial

    key = jax.random.PRNGKey(0)
    kx, kg, kwx, kbx, kwg, kbg = jax.random.split(key, 6)
    x = jax.random.normal(kx, (N, F_x, H, W), dtype=jnp.float32)
    g = jax.random.normal(kg, (N, F_g, Hg, Wg), dtype=jnp.float32)

    # torch.nn.Linear default init: U(-1/sqrt(fan_in), 1/sqrt(fan_in))
    lim_x = 1.0 / np.sqrt(F_x)
    lim_g = 1.0 / np.sqrt(F_g)
    w_x = jax.random.uniform(kwx, (F_x, F_x), jnp.float32, -lim_x, lim_x)
    b_x = jax.random.uniform(kbx, (F_x,), jnp.float32, -lim_x, lim_x)
    w_g = jax.random.uniform(kwg, (F_x, F_g), jnp.float32, -lim_g, lim_g)
    b_g = jax.random.uniform(kbg, (F_x,), jnp.float32, -lim_g, lim_g)

    y = cca_forward(g, x, w_x, b_x, w_g, b_g)
    y = jax.block_until_ready(y)

    # pure-JAX reference of CCA.forward (PyTorch semantics)
    avg_x = jnp.mean(x, axis=(2, 3))                       # (N, F_x)
    avg_g = jnp.mean(g, axis=(2, 3))                       # (N, F_g)
    att_x = avg_x @ w_x.T + b_x                            # Linear(F_x, F_x)
    att_g = avg_g @ w_g.T + b_g                            # Linear(F_g, F_x)
    scale = jax.nn.sigmoid((att_x + att_g) / 2.0)[:, :, None, None]
    y_ref = jnp.maximum(x * scale, 0.0)

    assert y.shape == x.shape
    np.testing.assert_allclose(np.asarray(y), np.asarray(y_ref),
                               rtol=1e-4, atol=1e-5)
    print("KERNEL_OK")
</pallas_src>

<mosaic_0001>
module attributes {stable_mosaic.version = 11 : i64} {
  func.func @_cca_kernel(%arg0: i32, %arg1: memref<1x4x256xf32, #tpu.memory_space<vmem>>, %arg2: memref<1x8x256xf32, #tpu.memory_space<vmem>>, %arg3: memref<4x4xf32, #tpu.memory_space<vmem>>, %arg4: memref<8x4xf32, #tpu.memory_space<vmem>>, %arg5: memref<1x4xf32, #tpu.memory_space<vmem>>, %arg6: memref<1x4x256xf32, #tpu.memory_space<vmem>>) attributes {dimension_semantics = [#tpu.dimension_semantics<parallel>], iteration_bounds = array<i64: 2>, scalar_prefetch = 0 : i64, scratch_operands = 0 : i64, tpu.core_type = #tpu.core_type<tc>, window_params = [{transform_indices = @transform_0, window_bounds = array<i64: 1, 4, 256>}, {transform_indices = @transform_1, window_bounds = array<i64: 1, 8, 256>}, {pipeline_mode = #tpu.pipeline_mode<synchronous>, transform_indices = @transform_2, window_bounds = array<i64: 4, 4>}, {pipeline_mode = #tpu.pipeline_mode<synchronous>, transform_indices = @transform_3, window_bounds = array<i64: 8, 4>}, {pipeline_mode = #tpu.pipeline_mode<synchronous>, transform_indices = @transform_4, window_bounds = array<i64: 1, 4>}, {transform_indices = @transform_5, window_bounds = array<i64: 1, 4, 256>}]} {
    %c0 = arith.constant 0 : index
    %c0_0 = arith.constant 0 : index
    %c0_1 = arith.constant 0 : index
    %0 = vector.load %arg1[%c0, %c0_0, %c0_1] : memref<1x4x256xf32, #tpu.memory_space<vmem>>, vector<1x4x256xf32>
    %c0_2 = arith.constant 0 : index
    %c0_3 = arith.constant 0 : index
    %c0_4 = arith.constant 0 : index
    %1 = vector.load %arg2[%c0_2, %c0_3, %c0_4] : memref<1x8x256xf32, #tpu.memory_space<vmem>>, vector<1x8x256xf32>
    %cst = arith.constant dense<0.000000e+00> : vector<1x4xf32>
    %2 = vector.multi_reduction <add>, %0, %cst [2] : vector<1x4x256xf32> to vector<1x4xf32>
    %cst_5 = arith.constant dense<0.000000e+00> : vector<1x8xf32>
    %3 = vector.multi_reduction <add>, %1, %cst_5 [2] : vector<1x8x256xf32> to vector<1x8xf32>
    %c0_6 = arith.constant 0 : index
    %c0_7 = arith.constant 0 : index
    %4 = vector.load %arg3[%c0_6, %c0_7] : memref<4x4xf32, #tpu.memory_space<vmem>>, vector<4x4xf32>
    %cst_8 = arith.constant dense<0.000000e+00> : vector<1x4xf32>
    %5 = tpu.matmul %2, %4, %cst_8 {dimension_numbers = #tpu.dot_dimension_numbers<[1], [0], [0], [1], [0, 0, 1, 1], [], []>} : vector<1x4xf32>, vector<4x4xf32>, vector<1x4xf32> -> vector<1x4xf32>
    %c0_9 = arith.constant 0 : index
    %c0_10 = arith.constant 0 : index
    %6 = vector.load %arg4[%c0_9, %c0_10] : memref<8x4xf32, #tpu.memory_space<vmem>>, vector<8x4xf32>
    %cst_11 = arith.constant dense<0.000000e+00> : vector<1x4xf32>
    %7 = tpu.matmul %3, %6, %cst_11 {dimension_numbers = #tpu.dot_dimension_numbers<[1], [0], [0], [1], [0, 0, 1, 1], [], []>} : vector<1x8xf32>, vector<8x4xf32>, vector<1x4xf32> -> vector<1x4xf32>
    %8 = arith.addf %5, %7 : vector<1x4xf32>
    %c0_12 = arith.constant 0 : index
    %c0_13 = arith.constant 0 : index
    %9 = vector.load %arg5[%c0_12, %c0_13] : memref<1x4xf32, #tpu.memory_space<vmem>>, vector<1x4xf32>
    %10 = arith.addf %8, %9 : vector<1x4xf32>
    %11 = arith.negf %10 : vector<1x4xf32>
    %12 = math.exp %11 : vector<1x4xf32>
    %cst_14 = arith.constant 1.000000e+00 : f32
    %13 = vector.broadcast %cst_14 : f32 to vector<1x4xf32>
    %14 = arith.addf %13, %12 : vector<1x4xf32>
    %15 = arith.divf %13, %14 : vector<1x4xf32>
    %16 = vector.shape_cast %15 : vector<1x4xf32> to vector<1x4x1xf32>
    %17 = vector.broadcast %16 : vector<1x4x1xf32> to vector<1x4x256xf32>
    %18 = arith.mulf %0, %17 : vector<1x4x256xf32>
    %cst_15 = arith.constant 0.000000e+00 : f32
    %19 = vector.broadcast %cst_15 : f32 to vector<1x4x256xf32>
    %20 = arith.maximumf %18, %19 : vector<1x4x256xf32>
    %c0_16 = arith.constant 0 : index
    %c0_17 = arith.constant 0 : index
    %c0_18 = arith.constant 0 : index
    %21 = vector.load %arg6[%c0_16, %c0_17, %c0_18] : memref<1x4x256xf32, #tpu.memory_space<vmem>>, vector<1x4x256xf32>
    tpu.vector_store %arg6[%c0_16, %c0_17, %c0_18], %20 {strides = array<i32>} : memref<1x4x256xf32, #tpu.memory_space<vmem>>, vector<1x4x256xf32>,
    return
  }
  func.func @transform_0(%arg0: i32) -> (i32, i32, i32) {
    %c0_i32 = arith.constant 0 : i32
    %c0_i32_0 = arith.constant 0 : i32
    %c0_i32_1 = arith.constant 0 : i32
    return %arg0, %c0_i32, %c0_i32_0 : i32, i32, i32
  }
  func.func @transform_1(%arg0: i32) -> (i32, i32, i32) {
    %c0_i32 = arith.constant 0 : i32
    %c0_i32_0 = arith.constant 0 : i32
    %c0_i32_1 = arith.constant 0 : i32
    return %arg0, %c0_i32, %c0_i32_0 : i32, i32, i32
  }
  func.func @transform_2(%arg0: i32) -> (i32, i32) {
    %c0_i32 = arith.constant 0 : i32
    %c0_i32_0 = arith.constant 0 : i32
    %c0_i32_1 = arith.constant 0 : i32
    return %c0_i32, %c0_i32_0 : i32, i32
  }
  func.func @transform_3(%arg0: i32) -> (i32, i32) {
    %c0_i32 = arith.constant 0 : i32
    %c0_i32_0 = arith.constant 0 : i32
    %c0_i32_1 = arith.constant 0 : i32
    return %c0_i32, %c0_i32_0 : i32, i32
  }
  func.func @transform_4(%arg0: i32) -> (i32, i32) {
    %c0_i32 = arith.constant 0 : i32
    %c0_i32_0 = arith.constant 0 : i32
    %c0_i32_1 = arith.constant 0 : i32
    return %c0_i32, %c0_i32_0 : i32, i32
  }
  func.func @transform_5(%arg0: i32) -> (i32, i32, i32) {
    %c0_i32 = arith.constant 0 : i32
    %c0_i32_0 = arith.constant 0 : i32
    %c0_i32_1 = arith.constant 0 : i32
    return %arg0, %c0_i32, %c0_i32_0 : i32, i32, i32
  }
}

</mosaic_0001>

<bundles_post_ra>
// kernel: tpu_custom_call.1
= control target key start
LH: loop header
LB: loop body
LE: loop exit
PB: predicated region body
PF: predicated region fallthrough
CT: control target
= control target key end

     0   :  { %10 = vsyncpa [#allocation3], 0  ;;  %s1075_s0 = inlined_call_operand.hbm [shape: f32[2,4,256], index: 0, kind: input, shape index: {}]   ;;  %s1076_s1 = inlined_call_operand.hbm [shape: f32[2,8,256], index: 1, kind: input, shape index: {}]   ;;  %s1077_s2 = inlined_call_operand.vmem [shape: f32[4,4], index: 2, kind: input, shape index: {}]   ;;  %s1078_s3 = inlined_call_operand.vmem [shape: f32[8,4], index: 3, kind: input, shape index: {}]   ;;  %s1079_s4 = inlined_call_operand.vmem [shape: f32[1,4], index: 4, kind: input, shape index: {}]   ;;  %s1080_s5 = inlined_call_operand.hbm [shape: f32[2,4,256], index: 5, kind: output, shape index: {}]  }
   0x1   :  { %12 = vsyncpa [#allocation3 + $0x1], 0 }
   0x2   :  { %13 = vsyncpa [#allocation6], 0 }
   0x3   :  { %15 = vsyncpa [#allocation6 + $0x1], 0 }
   0x4   :  { %16 = vsyncpa [#allocation4], 0 }
   0x5   :  { %18 = vsyncpa [#allocation4 + $0x1], 0  ;;  %s858_s18 = smov 0   ;;  %s860_s19 = smov 0  }
   0x6   :  { %s862_s20 = smov 0   ;;  %s864_s21 = smov 0  }
   0x7 LB: > { %s879_s22 = sadd.s32 4294967295, %s820_s21   ;;  %s592_s23 = sadd.s32 4294967294, %s820_s21   ;;  %s820_s21 = sphi %s864_s21, %s1099_s21   ;;  %s816_s20 = sphi %s862_s20, %s1098_s20   ;;  %s812_s19 = sphi %s860_s19, %s1097_s19   ;;  %s808_s18 = sphi %s858_s18, %s1096_s18  }
   0x8   : > { %s883_s24 = sadd.s32 1, %s820_s21   ;;  %s31_s25 = sadd.s32 1, %s816_s20 }
   0x9   : > { %s28_s26 = ssub.s32 %s820_s21, %s883_s24  ;;  %p38_p0 = scmp.ne.s32.totalorder %s816_s20, %s812_s19 }
   0xa   : > { %p29_p1 = scmp.eq.s32.totalorder %s28_s26, 0  ;;  %p39_p2 = scmp.eq.s32.totalorder %s820_s21, 0 }
   0xb   : > { %p44_p3 = scmp.ne.s32.totalorder %s812_s19, %s808_s18  ;;  %p45_p4 = scmp.eq.s32.totalorder %s879_s22, 0 }
   0xc   : > { %s895_s27 = scalar_select %p29_p1, %s816_s20, %s31_s25  }
   0xd   : > { %p897_p5 = por %p39_p2, %p38_p0  ;;  %p901_p6 = por %p45_p4, %p44_p3 }
   0xe   : > { %p157_p7 = scmp.eq.s32.totalorder %s879_s22, 1  ;;  %p163_p8 = scmp.eq.s32.totalorder %s592_s23, 1 }
   0xf   : > { %s1084_s29 = scalar_select %p901_p6, 1, 0 }
  0x10   : > { %p648_p10 = scmp.lt.s32.totalorder %s820_s21, 2  ;;  %p908_p11 = por %p157_p7, %p38_p0 }
  0x11   : > { %p912_p12 = por %p163_p8, %p44_p3  ;;  %s917_s7 = sand.u32 1, %s816_s20  }
  0x12   : > { %s1085_s30 = scalar_select %p908_p11, 1, 0 }
  0x13   : > { %s1086_s6 = scalar_select %p912_p12, 1, 0 }
  0x14   : > { %s614_s8 = sshll.u32 %s820_s21, 7  ;;  %s595_s9 = sshll.u32 %s917_s7, 3 }
  0x15   : > { %s924_s12 = scalar_lea.hbm %s1075_s0, %s614_s8  ;;  %s196_s13 = scalar_lea.vmem [#allocation2], %s595_s9 }
  0x16   : > { %s204_s14 = sshll.u32 %s196_s13, 4  ;;  %p928_p13 = pnand %p648_p10, %p897_p5  ;;  %s932_s14 = int_to_ptr.vmem [resolvable:$true] %s204_s14 }
  0x17   : > { %s193_s16 = scalar_lea.sflag [#allocation3], %s917_s7  ;;  %s690_s17 = scalar_lea.hbm %s924_s12, 128 }
  0x18   : > { %p691_p2 = scmp.ne.s32.totalorder %s924_s12, %s690_s17  ;;  %p692_p3 = pneg %p928_p13 }
  0x19   : > { %s695_s26 = scalar_lea.hbm %s1075_s0, 256  ;;  %p696_p5 = scmp.lt.u32.totalorder %s924_s12, %s1075_s0 }
  0x1a   : > { %p693_p4 = pnand %p692_p3, %p691_p2  ;;  %p697_p8 = scmp.lt.u32.totalorder %s695_s26, %s690_s17 }
  0x1b   : > { %p699_p9 = scmp.lt.u32.totalorder %s690_s17, %s924_s12 }
  0x1c   : > { %p694_p7 = pneg %p693_p4  ;;  %p698_p10 = por %p697_p8, %p696_p5 }
  0x1e   : > { %p700_p0 = por %p699_p9, %p698_p10 }
  0x20   : > { %p701_p1 = pnand %p700_p0, %p694_p7 }
  0x22   : > { %704 = shalt.err (!%p701_p1)
}
  0x23   : > { %s705_s9 = scalar_lea.vmem %s932_s14, 128  ;;  %s822_s10 = smov [#allocation2]  }
  0x24   : > { %p706_p2 = scmp.ne.s32.totalorder %s932_s14, %s705_s9  ;;  %s710_s11 = sshll.u32 %s822_s10, 4  ;;  %s711_s11 = int_to_ptr.vmem [resolvable:$false] %s710_s11 }
  0x25   : > { %s712_s13 = scalar_lea.vmem %s711_s11, 256  ;;  %p713_p11 = scmp.lt.s32.totalorder %s932_s14, %s711_s11 }
  0x26   : > { %p708_p4 = pnand %p706_p2, %p692_p3  ;;  %p714_p5 = scmp.lt.s32.totalorder %s712_s13, %s705_s9 }
  0x28   : > { %p709_p12 = pneg %p708_p4  ;;  %p715_p8 = por %p714_p5, %p713_p11 }
  0x2a   : > { %p716_p9 = pnand %p715_p8, %p709_p12 }
  0x2c   : > { %719 = shalt.err (!%p716_p9)
}
  0x2d   : > { %640 = dma.hbm_to_vmem [thread:$0]  (!%p928_p13), %s924_s12, 128, %s932_s14, %s193_s16  }
  0x2e   : > { %p1088_p0 = scmp.lt.s32.totalorder %s820_s21, 3  ;;  %p1089_p1 = scmp.ge.s32.totalorder %s820_s21, 1 }
  0x2f   : > { %s598_s23 = sshll.u32 %s917_s7, 4  ;;  %s615_s25 = sshll.u32 %s820_s21, 8 }
  0x30   : > { %p966_p7 = pnand %p1089_p1, %p1088_p0  ;;  %s975_s8 = scalar_lea.hbm %s1076_s1, %s615_s25 }
  0x31   : > { %s215_s9 = scalar_lea.vmem [#allocation5], %s598_s23  ;;  %s212_s12 = scalar_lea.sflag [#allocation6], %s917_s7 }
  0x32   : > { %s1090_s17 = scalar_select %p966_p7, 1, 0 }
  0x33   : > { %s223_s10 = sshll.u32 %s215_s9, 4  ;;  %s720_s14 = scalar_lea.hbm %s975_s8, 256  ;;  %s224_s10 = int_to_ptr.vmem [resolvable:$true] %s223_s10 }
  0x34   : > { %p721_p11 = scmp.ne.s32.totalorder %s975_s8, %s720_s14  ;;  %s725_s13 = scalar_lea.hbm %s1076_s1, 512 }
  0x35   : > { %p726_p2 = scmp.lt.u32.totalorder %s975_s8, %s1076_s1  ;;  %p727_p4 = scmp.lt.u32.totalorder %s725_s13, %s720_s14 }
  0x36   : > { %p723_p12 = pnand %p721_p11, %p692_p3  ;;  %p729_p8 = scmp.lt.u32.totalorder %s720_s14, %s975_s8 }
  0x37   : > { %p728_p5 = por %p727_p4, %p726_p2 }
  0x38   : > { %p724_p10 = pneg %p723_p12 }
  0x39   : > { %p730_p9 = por %p729_p8, %p728_p5 }
  0x3b   : > { %p731_p0 = pnand %p730_p9, %p724_p10 }
  0x3d   : > { %734 = shalt.err (!%p731_p0)
}
  0x3e   : > { %s735_s7 = scalar_lea.vmem %s224_s10, 256  ;;  %s823_s23 = smov [#allocation5]  }
  0x3f   : > { %p736_p1 = scmp.ne.s32.totalorder %s224_s10, %s735_s7  ;;  %s740_s28 = sshll.u32 %s823_s23, 4  ;;  %s741_s28 = int_to_ptr.vmem [resolvable:$false] %s740_s28 }
  0x40   : > { %s742_s9 = scalar_lea.vmem %s741_s28, 512  ;;  %p743_p6 = scmp.lt.s32.totalorder %s224_s10, %s741_s28 }
  0x41   : > { %p738_p11 = pnand %p736_p1, %p692_p3  ;;  %p744_p7 = scmp.lt.s32.totalorder %s742_s9, %s735_s7 }
  0x43   : > { %p739_p12 = pneg %p738_p11  ;;  %p745_p2 = por %p744_p7, %p743_p6 }
  0x45   : > { %p746_p4 = pnand %p745_p2, %p739_p12 }
  0x47   : > { %749 = shalt.err (!%p746_p4)
}
  0x48   : > { %643 = dma.hbm_to_vmem [thread:$0]  (!%p928_p13), %s975_s8, 256, %s224_s10, %s212_s12  }
  0x49   : > { %p1091_p10 = scmp.ne.s32.totalorder %s1090_s17, 0 }
  0x4a   : > { %s1000_s14 = sand.u32 (!%p1091_p10), 1, %s812_s19   ;;  %p1092_p6 = scmp.ne.s32.totalorder (!%p1091_p10), %s1084_s29, 0 }
  0x4b   : > { %232 = sbr.rel (%p1091_p10) target bundleno = 619 (0x26b), region = 40  ;;  %s602_s16 = sshll.u32 (!%p1091_p10), %s1000_s14, 3 }
  0x4c   : > { %s235_s11 = scalar_lea.sflag (!%p1091_p10), [#allocation3], %s1000_s14  ;;  %s238_s13 = scalar_lea.vmem (!%p1091_p10), [#allocation2], %s602_s16 }
  0x52   : > { %795 = dma.done.wait (%p1092_p6), %s235_s11, 128  }
  0x53   : > { %797 = vsyncadd (%p1092_p6), %s235_s11, 4294967168  ;;  %s603_s15 = sshll.u32 %s1000_s14, 4  ;;  %s244_s17 = scalar_lea.sflag [#allocation6], %s1000_s14 }
  0x54   : > { %s247_s8 = scalar_lea.vmem [#allocation5], %s603_s15 }
  0x55   : > { %799 = dma.done.wait (%p1092_p6), %s244_s17, 256  }
  0x56   : > { %801 = vsyncadd (%p1092_p6), %s244_s17, 4294967040  ;;  %vm285_vm0 = vcmask 1043456   ;;  %v279_v0 = vld [vmem:[%s238_s13] sm:$0xff]  ;;  %v280_v4 = vld [vmem:[%s247_s8] sm:$0xff]  ;;  %v824_v8 = vmov 0.0   ;;  %vm825_vm1 = vmmov 0   ;;  %v297_v11 = vlaneseq }
  0x57   : > { %v283_v1 = vcombine.high %v279_v0, %v279_v0  ;;  %v286_v2 = vsel %vm285_vm0, %v279_v0, 0.0  ;;  %v281_v5 = vld [vmem:[%s247_s8 + $0x8] sm:$0xff]  ;;  %626 = vmatprep.subr.mxu1 %v824_v8  ;;  %v294_v9 = vld [vmem:[%s1077_s2] sm:$0xf]  ;;  %621 = vmatprep.subr.mxu0 %v824_v8  ;;  %vm381_vm2 = vcmask 31744   ;;  %vm303_vm3 = vcmask 64512  }
  0x58   : > { %v291_v7 = vadd.f32 %v281_v5, %v280_v4  ;;  %627 = vmatpush3.msk.msra.mxu1 %vm285_vm0, %v294_v9  ;;  %628 = vmatprep.mubr.msk.f32.mxu1 %vm825_vm1, %v824_v8  ;;  %v295_v10 = vld [vmem:[%s1078_s3] sm:$0xff]  ;;  %v298_v12 = vand.u32 127, %v297_v11  ;;  %v300_v13 = vshrl.u32 %v297_v11, 7  ;;  %v826_v32 = vmov 839922192   ;;  %s616_s23 = sshll.u32 %s879_s22, 7 }
  0x59   : > { %v287_v3 = vsel %vm285_vm0, %v283_v1, 0.0  ;;  %623 = vmatprep.mubr.msk.f32.mxu0 %vm825_vm1, %v824_v8  ;;  %622 = vmatpush3.msra.mxu0 %v295_v10  ;;  %v457_v22 = vld [vmem:[%s1079_s4] sm:$0x1]  ;;  %v474_v33 = vunpack.c.l.s4 %v826_v32  ;;  %s278_s28 = scalar_lea.vmem [#allocation7], %s602_s16  ;;  %s1031_s15 = scalar_lea.hbm %s1080_s5, %s616_s23 }
  0x5a   : > { %v288_v6 = vadd.f32 %v287_v3, %v286_v2  ;;  %v301_v14 = vsub.s32 %v298_v12, %v300_v13  ;;  %v467_v29 = vsub.s32 0, %v300_v13  ;;  %s499_s9 = sshll.u32 %s278_s28, 4  ;;  %s485_s17 = scalar_lea.sflag [#allocation4], %s1000_s14  ;;  %s1033_s9 = int_to_ptr.vmem [resolvable:$true] %s499_s9 }
  0x5b   : > { %v475_v34 = vunpack.c.0.s8 %v474_v33  ;;  %s750_s8 = scalar_lea.vmem %s1033_s9, 128  ;;  %p1093_p3 = scmp.ne.s32.totalorder %s1085_s30, 0 }
  0x5c   : > { %289 = vadd.xlane.f32.xlu0 %v288_v6  ;;  %p751_p13 = scmp.ne.s32.totalorder %s1033_s9, %s750_s8  ;;  %s827_s22 = smov [#allocation7]  }
  0x5d   : > { %v478_v35 = vsub.s32 %v475_v34, %v300_v13  ;;  %s754_s16 = sshll.u32 %s827_s22, 4  ;;  %s755_s16 = int_to_ptr.vmem [resolvable:$false] %s754_s16 }
  0x5e   : > { %p752_p7 = pnand %p751_p13, %p1093_p3  ;;  %s756_s10 = scalar_lea.vmem %s755_s16, 256 }
  0x5f   : > { %p757_p8 = scmp.lt.s32.totalorder %s1033_s9, %s755_s16  ;;  %p758_p9 = scmp.lt.s32.totalorder %s756_s10, %s750_s8 }
  0x60   : > { %292 = vadd.xlane.f32.xlu0 %v291_v7  ;;  %p753_p5 = pneg %p752_p7 }
  0x61   : > { %p759_p0 = por %p758_p9, %p757_p8 }
  0x63   : > { %p760_p1 = pnand %p759_p0, %p753_p5 }
  0xe9   : > { %v290_v15 = vpop.xlane.xlu0 %289 }
  0xea   : > { %v380_v16 = vrot.slane %v290_v15, %v301_v14 }
  0xec   : > { %629 = vmatmul.mubr.msk.f32.vlgmr.msra.gmra.mrb[0].mxu1 %vm381_vm2, %v380_v16 }
  0xed   : > { %v293_v17 = vpop.xlane.xlu0 %292 }
  0xee   : > { %v302_v18 = vrot.slane %v293_v17, %v301_v14 }
  0xf0   : > { %624 = vmatmul.mubr.msk.f32.vlgmr.msra.gmra.mrb[0].mxu0 %vm303_vm3, %v302_v18 }
 0x1bf   : > { %v453_v19 = vpop.f32.mrb[0].mxu1 }
 0x1c0   : > { %v630_v20 = vpop.f32.mrb[1].mxu1 }
 0x1c3   : > { %v372_v21 = vpop.f32.mrb[0].mxu0 }
 0x1c4   : > { %v454_v23 = vadd.f32 %v453_v19, %v372_v21  ;;  %v625_v24 = vpop.f32.mrb[1].mxu0 }
 0x1c6   : > { %v458_v25 = vadd.f32 %v457_v22, %v454_v23 }
 0x1c8   : > { %v608_v26 = vmul.f32 -1.442695, %v458_v25 }
 0x1ca   : > { %686 = vpow2.f32 %v608_v26 }
 0x1d4   : > { %v687_v27 = vpop.eup %686 }
 0x1d5   : > { %v462_v28 = vadd.f32 1.0, %v687_v27 }
 0x1d7   : > { %688 = vrcp.f32 %v462_v28 }
 0x1e1   : > { %v689_v30 = vpop.eup %688 }
 0x1e2   : > { %v468_v31 = vrot.slane %v689_v30, %v467_v29 }
 0x1e4   : > { %470 = vbcast.lane.b32.xlu1 %v468_v31, 256 }
 0x256   : > { %v471_v36 = vpop.permute.xlu1 %470 }
 0x257   : > { %v479_v37 = vrot.slane %v471_v36, %v478_v35 }
 0x259   : > { %v481_v38 = vmul.f32 %v479_v37, %v279_v0 }
 0x25b   : > { %v482_v39 = vmax.f32 %v481_v38, 0.0 }
 0x25d   : > { %483 = vst [vmem:[%s278_s28] sm:$0xff] %v482_v39 }
 0x25e   : > { %763 = shalt.err (!%p760_p1)
}
 0x25f   : > { %s764_s14 = scalar_lea.hbm %s1031_s15, 128  ;;  %s768_s25 = scalar_lea.hbm %s1080_s5, 256 }
 0x260   : > { %p765_p11 = scmp.ne.s32.totalorder %s1031_s15, %s764_s14  ;;  %p769_p4 = scmp.lt.u32.totalorder %s1031_s15, %s1080_s5 }
 0x261   : > { %p770_p10 = scmp.lt.u32.totalorder %s768_s25, %s764_s14  ;;  %p772_p13 = scmp.lt.u32.totalorder %s764_s14, %s1031_s15 }
 0x262   : > { %p766_p12 = pnand %p765_p11, %p1093_p3 }
 0x263   : > { %p771_p6 = por %p770_p10, %p769_p4 }
 0x264   : > { %p767_p2 = pneg %p766_p12 }
 0x265   : > { %p773_p7 = por %p772_p13, %p771_p6 }
 0x267   : > { %p774_p5 = pnand %p773_p7, %p767_p2 }
 0x269   : > { %777 = shalt.err (!%p774_p5)
}
 0x26a   : > { %635 = dma.vmem_to_hbm [thread:$0]  (%p1093_p3), %s1033_s9, 128, %s1031_s15, %s485_s17  }
 0x26b PF: > { %s511_s23 = sand.u32 1, %s808_s18   ;;  %p1094_p8 = scmp.ne.s32.totalorder %s1086_s6, 0 }
 0x26c   : > { %p1095_p9 = scmp.ge.s32.totalorder %s820_s21, 2  ;;  %s512_s28 = scalar_lea.sflag [#allocation4], %s511_s23 }
 0x26e   : > { %p645_p0 = pnand %p1095_p9, %p1094_p8 }
 0x270   : > { %803 = dma.done.wait (!%p645_p0), %s512_s28, 128  }
 0x271   : > { %805 = vsyncadd (!%p645_p0), %s512_s28, 4294967168  ;;  %p21_p1 = scmp.ge.s32.totalorder %s883_s24, 4   ;;  %s1096_s18 = smov %s812_s19 }
 0x272   : > { %s1097_s19 = smov %s816_s20  ;;  %s1098_s20 = smov %s895_s27 }
 0x273   : > { %s1099_s21 = smov %s883_s24  ;;  %23 = sbr.rel (!%p21_p1) target bundleno = 7 (0x7), region = 98 }
 0x27a   :  { %517 = vsyncpa [#allocation3], 1 }
 0x27b   :  { %519 = vsyncpa [#allocation3 + $0x1], 1 }
 0x27c   :  { %520 = vsyncpa [#allocation6], 1 }
 0x27d   :  { %522 = vsyncpa [#allocation6 + $0x1], 1 }
 0x27e   :  { %523 = vsyncpa [#allocation4], 1 }
 0x27f   :  { %525 = vsyncpa [#allocation4 + $0x1], 1 }

</bundles_post_ra>
